<compile_context>
chip_gen: v6e
topology: v6e:2x2x1
jax: 0.10.0
libtpu: 0.0.40
codegen_flags: <defaults>
</compile_context>

<pallas_src>
import jax
import jax.numpy as jnp
from jax import lax
from jax.experimental import pallas as pl
from jax.experimental.pallas import tpu as pltpu

KSIZE = 7
PAD = KSIZE // 2  # 3


def dcloss_kernel(x_ref, o_ref, pad_ref):
    # x_ref:   (C, H, W)  one batch element, native dtype (f32 or bf16)
    # pad_ref: (H + 2*PAD, W + 2*PAD) scratch holding the +inf-padded plane
    C, H, W = x_ref.shape
    Hp, Wp = H + 2 * PAD, W + 2 * PAD

    def inf_like(shape):
        return jnp.full(shape, jnp.inf, dtype=pad_ref.dtype)

    # 1) Re-fill only the +inf halo strips (the data region is fully
    #    overwritten below, so this is all the init the scratch ever needs).
    pad_ref[0:PAD, :] = inf_like((PAD, Wp))            # top rows
    pad_ref[PAD + H:Hp, :] = inf_like((PAD, Wp))       # bottom rows
    pad_ref[:, 0:PAD] = inf_like((Hp, PAD))            # left cols
    pad_ref[:, PAD + W:Wp] = inf_like((Hp, PAD))       # right cols

    # 2) Running channel-min: one (H, W) plane live at a time (bounds vreg /
    #    VMEM temporaries even for large C).  Min is exact in any float dtype.
    cmin = lax.fori_loop(1, C, lambda c, m: jnp.minimum(m, x_ref[c]),
                         x_ref[0], unroll=True)
    pad_ref[PAD:PAD + H, PAD:PAD + W] = cmin.astype(pad_ref.dtype)

    # 3) Separable 7-tap min pool, log-tree (widths 2 -> 4 -> 7) per axis.
    #    Level-1 operands are sliced directly off the ref; the window starts
    #    at (0, 0) so the base read is aligned and only the small 1/2/3-lane
    #    (and -sublane) tree shifts remain.
    # along W (lane axis)
    a = jnp.minimum(pad_ref[0:Hp, 0:Wp - 1], pad_ref[0:Hp, 1:Wp])   # 2-wide
    a = jnp.minimum(a[:, 0:Wp - 3], a[:, 2:Wp - 1])                 # 4-wide
    a = jnp.minimum(a[:, 0:W], a[:, 3:W + 3])                       # 7-wide -> (Hp, W)
    # along H (sublane axis)
    b = jnp.minimum(a[0:Hp - 1, :], a[1:Hp, :])
    b = jnp.minimum(b[0:Hp - 3, :], b[2:Hp - 1, :])
    b = jnp.minimum(b[0:H, :], b[3:H + 3, :])                       # (H, W)

    # 4) Per-batch L1 partial sum (target is all-zeros -> just |.| sum).
    #    Mins/abs are exact in the plane dtype; accumulate the sum in f32.
    s = jnp.sum(jnp.abs(b).astype(jnp.float32))
    o_ref[...] = jnp.full(o_ref.shape, s, dtype=o_ref.dtype)


def dcloss(x):
    """x: (N, C, H, W) float array. Returns the scalar f32 DC loss."""
    N, C, H, W = x.shape
    if x.dtype not in (jnp.dtype(jnp.float32), jnp.dtype(jnp.bfloat16)):
        x = x.astype(jnp.float32)
    # bf16 input -> keep the whole pooling plane in bf16 (exact mins, halves
    # VPU / scratch traffic on v6e/v7x); otherwise f32.
    plane_dtype = x.dtype
    Hp, Wp = H + 2 * PAD, W + 2 * PAD

    # Explicit VMEM budget: double-buffered input block + padded scratch +
    # pooling temporaries, with headroom (v7x has only 64 MiB of VMEM).
    elt_in = x.dtype.itemsize
    elt_pl = jnp.dtype(plane_dtype).itemsize
    est = (2 * C * H * W * elt_in            # double-buffered input block
           + Hp * Wp * elt_pl                # padded scratch
           + 8 * H * W * elt_pl              # min-tree temporaries
           + (4 << 20))                      # headroom
    vmem_limit = int(min(max(est, 32 << 20), 64 << 20))

    partials = pl.pallas_call(
        dcloss_kernel,
        out_shape=jax.ShapeDtypeStruct((N, 1, 1), jnp.float32),
        grid_spec=pltpu.PrefetchScalarGridSpec(
            num_scalar_prefetch=0,
            grid=(N,),
            in_specs=[
                pl.BlockSpec((pl.Squeezed(), C, H, W), lambda b: (b, 0, 0, 0)),
            ],
            out_specs=pl.BlockSpec((1, 1, 1), lambda b: (b, 0, 0)),
            scratch_shapes=[pltpu.VMEM((Hp, Wp), plane_dtype)],
        ),
        compiler_params=pltpu.CompilerParams(
            dimension_semantics=("parallel",),
            vmem_limit_bytes=vmem_limit,
        ),
    )(x)

    # L1Loss against an all-zero target == mean(|.|) over N*H*W elements
    # (broadcasting against the zero target does not alter the mean).
    return jnp.sum(partials) / jnp.float32(N * H * W)


def dcloss_reference(x):
    """Pure-JAX reference for validation."""
    x = x.astype(jnp.float32)
    N, C, H, W = x.shape
    xp = jnp.pad(
        x, ((0, 0), (0, 0), (PAD, PAD), (PAD, PAD)),
        mode="constant", constant_values=jnp.inf,
    )
    pooled = jnp.full((N, C, H, W), jnp.inf, jnp.float32)
    for dh in range(KSIZE):
        for dw in range(KSIZE):
            pooled = jnp.minimum(pooled, xp[:, :, dh:dh + H, dw:dw + W])
    cmin = jnp.min(pooled, axis=1)              # (N, H, W)
    return jnp.mean(jnp.abs(cmin))


if __name__ == "__main__":
    key = jax.random.PRNGKey(0)
    # small shapes consistent with the module's forward (NCHW image input)
    x = jax.random.normal(key, (2, 4, 16, 16), dtype=jnp.float32)

    out = jax.block_until_ready(dcloss(x))
    ref = jax.block_until_ready(dcloss_reference(x))

    assert jnp.allclose(out, ref, rtol=1e-5, atol=1e-5), (out, ref)
    print("KERNEL_OK")
</pallas_src>

<mosaic_0001>
module attributes {stable_mosaic.version = 11 : i64} {
  func.func @dcloss_kernel(%arg0: i32, %arg1: memref<1x4x16x16xf32, #tpu.memory_space<vmem>>, %arg2: memref<1x1x1xf32, #tpu.memory_space<vmem>>, %arg3: memref<22x22xf32, #tpu.memory_space<vmem>>) attributes {dimension_semantics = [#tpu.dimension_semantics<parallel>], iteration_bounds = array<i64: 2>, scalar_prefetch = 0 : i64, scratch_operands = 1 : i64, tpu.core_type = #tpu.core_type<tc>, window_params = [{transform_indices = @transform_0, window_bounds = array<i64: 1, 4, 16, 16>}, {transform_indices = @transform_1, window_bounds = array<i64: 1, 1, 1>}]} {
    %cst = arith.constant 0x7F800000 : f32
    %0 = vector.broadcast %cst : f32 to vector<3x22xf32>
    %c0 = arith.constant 0 : index
    %c0_0 = arith.constant 0 : index
    %1 = vector.load %arg3[%c0, %c0_0] : memref<22x22xf32, #tpu.memory_space<vmem>>, vector<3x22xf32>
    tpu.vector_store %arg3[%c0, %c0_0], %0 {strides = array<i32>} : memref<22x22xf32, #tpu.memory_space<vmem>>, vector<3x22xf32>,
    %cst_1 = arith.constant 0x7F800000 : f32
    %2 = vector.broadcast %cst_1 : f32 to vector<3x22xf32>
    %c19 = arith.constant 19 : index
    %c0_2 = arith.constant 0 : index
    %3 = vector.load %arg3[%c19, %c0_2] : memref<22x22xf32, #tpu.memory_space<vmem>>, vector<3x22xf32>
    tpu.vector_store %arg3[%c19, %c0_2], %2 {strides = array<i32>} : memref<22x22xf32, #tpu.memory_space<vmem>>, vector<3x22xf32>,
    %cst_3 = arith.constant 0x7F800000 : f32
    %4 = vector.broadcast %cst_3 : f32 to vector<22x3xf32>
    %c0_4 = arith.constant 0 : index
    %c0_5 = arith.constant 0 : index
    %5 = vector.load %arg3[%c0_4, %c0_5] : memref<22x22xf32, #tpu.memory_space<vmem>>, vector<22x3xf32>
    tpu.vector_store %arg3[%c0_4, %c0_5], %4 {strides = array<i32>} : memref<22x22xf32, #tpu.memory_space<vmem>>, vector<22x3xf32>,
    %cst_6 = arith.constant 0x7F800000 : f32
    %6 = vector.broadcast %cst_6 : f32 to vector<22x3xf32>
    %c0_7 = arith.constant 0 : index
    %c19_8 = arith.constant 19 : index
    %7 = vector.load %arg3[%c0_7, %c19_8] : memref<22x22xf32, #tpu.memory_space<vmem>>, vector<22x3xf32>
    tpu.vector_store %arg3[%c0_7, %c19_8], %6 {strides = array<i32>} : memref<22x22xf32, #tpu.memory_space<vmem>>, vector<22x3xf32>,
    %c0_9 = arith.constant 0 : index
    %c0_10 = arith.constant 0 : index
    %c0_11 = arith.constant 0 : index
    %c0_12 = arith.constant 0 : index
    %8 = vector.load %arg1[%c0_9, %c0_10, %c0_11, %c0_12] : memref<1x4x16x16xf32, #tpu.memory_space<vmem>>, vector<1x1x16x16xf32>
    %9 = vector.shape_cast %8 : vector<1x1x16x16xf32> to vector<16x16xf32>
    %c1_i32 = arith.constant 1 : i32
    %c0_13 = arith.constant 0 : index
    %10 = arith.index_cast %c1_i32 : i32 to index
    %c0_14 = arith.constant 0 : index
    %c0_15 = arith.constant 0 : index
    %11 = vector.load %arg1[%c0_13, %10, %c0_14, %c0_15] : memref<1x4x16x16xf32, #tpu.memory_space<vmem>>, vector<1x1x16x16xf32>
    %12 = vector.shape_cast %11 : vector<1x1x16x16xf32> to vector<16x16xf32>
    %13 = arith.minimumf %9, %12 : vector<16x16xf32>
    %c2_i32 = arith.constant 2 : i32
    %c0_16 = arith.constant 0 : index
    %14 = arith.index_cast %c2_i32 : i32 to index
    %c0_17 = arith.constant 0 : index
    %c0_18 = arith.constant 0 : index
    %15 = vector.load %arg1[%c0_16, %14, %c0_17, %c0_18] : memref<1x4x16x16xf32, #tpu.memory_space<vmem>>, vector<1x1x16x16xf32>
    %16 = vector.shape_cast %15 : vector<1x1x16x16xf32> to vector<16x16xf32>
    %17 = arith.minimumf %13, %16 : vector<16x16xf32>
    %c3_i32 = arith.constant 3 : i32
    %c0_19 = arith.constant 0 : index
    %18 = arith.index_cast %c3_i32 : i32 to index
    %c0_20 = arith.constant 0 : index
    %c0_21 = arith.constant 0 : index
    %19 = vector.load %arg1[%c0_19, %18, %c0_20, %c0_21] : memref<1x4x16x16xf32, #tpu.memory_space<vmem>>, vector<1x1x16x16xf32>
    %20 = vector.shape_cast %19 : vector<1x1x16x16xf32> to vector<16x16xf32>
    %21 = arith.minimumf %17, %20 : vector<16x16xf32>
    %c3_i32_22 = arith.constant 3 : i32
    %c3 = arith.constant 3 : index
    %c3_23 = arith.constant 3 : index
    %22 = vector.load %arg3[%c3, %c3_23] : memref<22x22xf32, #tpu.memory_space<vmem>>, vector<16x16xf32>
    tpu.vector_store %arg3[%c3, %c3_23], %21 {strides = array<i32>} : memref<22x22xf32, #tpu.memory_space<vmem>>, vector<16x16xf32>,
    %c0_24 = arith.constant 0 : index
    %c0_25 = arith.constant 0 : index
    %23 = vector.load %arg3[%c0_24, %c0_25] : memref<22x22xf32, #tpu.memory_space<vmem>>, vector<22x21xf32>
    %c0_26 = arith.constant 0 : index
    %c1 = arith.constant 1 : index
    %24 = vector.load %arg3[%c0_26, %c1] : memref<22x22xf32, #tpu.memory_space<vmem>>, vector<22x21xf32>
    %25 = arith.minimumf %23, %24 : vector<22x21xf32>
    %26 = vector.extract_strided_slice %25 {offsets = [0, 0], sizes = [22, 19], strides = [1, 1]} : vector<22x21xf32> to vector<22x19xf32>
    %27 = vector.extract_strided_slice %25 {offsets = [0, 2], sizes = [22, 19], strides = [1, 1]} : vector<22x21xf32> to vector<22x19xf32>
    %28 = arith.minimumf %26, %27 : vector<22x19xf32>
    %29 = vector.extract_strided_slice %28 {offsets = [0, 0], sizes = [22, 16], strides = [1, 1]} : vector<22x19xf32> to vector<22x16xf32>
    %30 = vector.extract_strided_slice %28 {offsets = [0, 3], sizes = [22, 16], strides = [1, 1]} : vector<22x19xf32> to vector<22x16xf32>
    %31 = arith.minimumf %29, %30 : vector<22x16xf32>
    %32 = vector.extract_strided_slice %31 {offsets = [0, 0], sizes = [21, 16], strides = [1, 1]} : vector<22x16xf32> to vector<21x16xf32>
    %33 = vector.extract_strided_slice %31 {offsets = [1, 0], sizes = [21, 16], strides = [1, 1]} : vector<22x16xf32> to vector<21x16xf32>
    %34 = arith.minimumf %32, %33 : vector<21x16xf32>
    %35 = vector.extract_strided_slice %34 {offsets = [0, 0], sizes = [19, 16], strides = [1, 1]} : vector<21x16xf32> to vector<19x16xf32>
    %36 = vector.extract_strided_slice %34 {offsets = [2, 0], sizes = [19, 16], strides = [1, 1]} : vector<21x16xf32> to vector<19x16xf32>
    %37 = arith.minimumf %35, %36 : vector<19x16xf32>
    %38 = vector.extract_strided_slice %37 {offsets = [0, 0], sizes = [16, 16], strides = [1, 1]} : vector<19x16xf32> to vector<16x16xf32>
    %39 = vector.extract_strided_slice %37 {offsets = [3, 0], sizes = [16, 16], strides = [1, 1]} : vector<19x16xf32> to vector<16x16xf32>
    %40 = arith.minimumf %38, %39 : vector<16x16xf32>
    %41 = math.absf %40 : vector<16x16xf32>
    %42 = vector.shape_cast %41 : vector<16x16xf32> to vector<1x16x16xf32>
    %cst_27 = arith.constant dense<0.000000e+00> : vector<1xf32>
    %43 = vector.multi_reduction <add>, %42, %cst_27 [1, 2] : vector<1x16x16xf32> to vector<1xf32>
    %44 = vector.shape_cast %43 : vector<1xf32> to vector<1x1x1xf32>
    %45 = vector.extract %44[0, 0, 0] : f32 from vector<1x1x1xf32>
    %46 = vector.broadcast %45 : f32 to vector<1x1x1xf32>
    %c0_28 = arith.constant 0 : index
    %c0_29 = arith.constant 0 : index
    %c0_30 = arith.constant 0 : index
    %47 = vector.load %arg2[%c0_28, %c0_29, %c0_30] : memref<1x1x1xf32, #tpu.memory_space<vmem>>, vector<1x1x1xf32>
    tpu.vector_store %arg2[%c0_28, %c0_29, %c0_30], %46 {strides = array<i32>} : memref<1x1x1xf32, #tpu.memory_space<vmem>>, vector<1x1x1xf32>,
    return
  }
  func.func @transform_0(%arg0: i32) -> (i32, i32, i32, i32) {
    %c0_i32 = arith.constant 0 : i32
    %c0_i32_0 = arith.constant 0 : i32
    %c0_i32_1 = arith.constant 0 : i32
    %c0_i32_2 = arith.constant 0 : i32
    return %arg0, %c0_i32, %c0_i32_0, %c0_i32_1 : i32, i32, i32, i32
  }
  func.func @transform_1(%arg0: i32) -> (i32, i32, i32) {
    %c0_i32 = arith.constant 0 : i32
    %c0_i32_0 = arith.constant 0 : i32
    %c0_i32_1 = arith.constant 0 : i32
    return %arg0, %c0_i32, %c0_i32_0 : i32, i32, i32
  }
}

</mosaic_0001>

<bundles_post_ra>
// kernel: tpu_custom_call.1
= control target key start
LH: loop header
LB: loop body
LE: loop exit
PB: predicated region body
PF: predicated region fallthrough
CT: control target
= control target key end

     0   :  { %6 = vsyncpa [#allocation4], 0  ;;  %s590_s0 = inlined_call_operand.hbm [shape: f32[2,4,16,16], index: 0, kind: input, shape index: {}]   ;;  %s591_s1 = inlined_call_operand.vmem [shape: f32[2,1,1], index: 1, kind: output, shape index: {}]  }
   0x1   :  { %8 = vsyncpa [#allocation4 + $0x1], 0  ;;  %s489_s6 = smov 0   ;;  %s491_s7 = smov 0  }
   0x2   :  { %s493_s8 = smov 0   ;;  %s495_s9 = smov 0  }
   0x3 LB: > { %s508_s10 = sadd.s32 4294967295, %s469_s9   ;;  %s511_s11 = sadd.s32 1, %s469_s9   ;;  %s469_s9 = sphi %s495_s9, %s600_s9   ;;  %s465_s8 = sphi %s493_s8, %s599_s8   ;;  %s461_s7 = sphi %s491_s7, %s598_s7   ;;  %s457_s6 = sphi %s489_s6, %s597_s6  }
   0x4   : > { %s18_s12 = ssub.s32 %s469_s9, %s511_s11  ;;  %s21_s13 = sadd.s32 1, %s465_s8 }
   0x5   : > { %p19_p0 = scmp.eq.s32.totalorder %s18_s12, 0  ;;  %p28_p1 = scmp.ne.s32.totalorder %s465_s8, %s461_s7 }
   0x6   : > { %p29_p2 = scmp.eq.s32.totalorder %s469_s9, 0  ;;  %p34_p3 = scmp.ne.s32.totalorder %s461_s7, %s457_s6 }
   0x7   : > { %s521_s14 = scalar_select %p19_p0, %s465_s8, %s21_s13  }
   0x8   : > { %p30_p4 = por %p29_p2, %p28_p1  ;;  %p35_p5 = scmp.eq.s32.totalorder %s508_s10, 0 }
   0x9   : > { %p367_p6 = scmp.lt.s32.totalorder %s469_s9, 2  ;;  %s84_s16 = sand.u32 1, %s465_s8  }
   0xa   : > { %p525_p7 = por %p35_p5, %p34_p3  ;;  %s345_s17 = sshll.u32 %s84_s16, 6 }
   0xb   : > { %s358_s18 = sshll.u32 %s469_s9, 10  ;;  %s88_s22 = scalar_lea.vmem [#allocation3], %s345_s17 }
   0xc   : > { %s593_s15 = scalar_select %p525_p7, 1, 0 }
   0xd   : > { %s534_s21 = scalar_lea.hbm %s590_s0, %s358_s18  ;;  %s95_s23 = sshll.u32 %s88_s22, 4  ;;  %s536_s23 = int_to_ptr.vmem [resolvable:$true] %s95_s23 }
   0xe   : > { %p538_p8 = pnand %p367_p6, %p30_p4  ;;  %s543_s25 = scalar_lea.sflag [#allocation4], %s84_s16 }
   0xf   : > { %s407_s26 = scalar_lea.hbm %s534_s21, 1024  ;;  %s412_s29 = scalar_lea.hbm %s590_s0, 2048 }
  0x10   : > { %p408_p10 = scmp.ne.s32.totalorder %s534_s21, %s407_s26  ;;  %p409_p11 = pneg %p538_p8 }
  0x11   : > { %p413_p0 = scmp.lt.s32.totalorder %s534_s21, %s590_s0  ;;  %p414_p1 = scmp.lt.s32.totalorder %s412_s29, %s407_s26 }
  0x12   : > { %p410_p12 = pnand %p409_p11, %p408_p10 }
  0x13   : > { %p415_p2 = por %p414_p1, %p413_p0 }
  0x14   : > { %p411_p13 = pneg %p410_p12 }
  0x16   : > { %p416_p3 = pnand %p415_p2, %p411_p13 }
  0x18   : > { %419 = shalt.err (!%p416_p3)
}
  0x19   : > { %s420_s3 = scalar_lea.vmem %s536_s23, 1024  ;;  %s471_s4 = smov [#allocation3]  }
  0x1a   : > { %p421_p4 = scmp.ne.s32.totalorder %s536_s23, %s420_s3  ;;  %s425_s5 = sshll.u32 %s471_s4, 4  ;;  %s426_s5 = int_to_ptr.vmem [resolvable:$false] %s425_s5 }
  0x1b   : > { %s427_s6 = scalar_lea.vmem %s426_s5, 2048  ;;  %p428_p10 = scmp.lt.s32.totalorder %s536_s23, %s426_s5 }
  0x1c   : > { %p423_p5 = pnand %p421_p4, %p409_p11  ;;  %p429_p12 = scmp.lt.s32.totalorder %s427_s6, %s420_s3 }
  0x1e   : > { %p424_p6 = pneg %p423_p5  ;;  %p430_p9 = por %p429_p12, %p428_p10 }
  0x20   : > { %p431_p7 = pnand %p430_p9, %p424_p6 }
  0x22   : > { %434 = shalt.err (!%p431_p7)
}
  0x23   : > { %s472_s12 = smov 128   ;;  %s473_s13 = smov 8  }
  0x24   : > { %366 = dma.hbm_to_vmem [thread:$0]  (!%p538_p8), %s534_s21, 1024, %s536_s23, %s543_s25, %s472_s12, %s472_s12, %s473_s13  }
  0x25   : > { %p103_p11 = scmp.lt.s32.totalorder %s469_s9, 3  ;;  %p595_p13 = scmp.ge.s32.totalorder %s469_s9, 1 }
  0x27   : > { %p104_p0 = pnand %p595_p13, %p103_p11 }
  0x28   : > { %s109_s16 = sand.u32 (!%p104_p0), 1, %s461_s7   ;;  %p596_p7 = scmp.ne.s32.totalorder (!%p104_p0), %s593_s15, 0 }
  0x29   : > { %107 = sbr.rel (%p104_p0) target bundleno = 756 (0x2f4), region = 24  ;;  %s349_s17 = sshll.u32 (!%p104_p0), %s109_s16, 6 }
  0x2a   : > { %s110_s18 = scalar_lea.sflag (!%p104_p0), [#allocation4], %s109_s16  ;;  %s113_s19 = scalar_lea.vmem (!%p104_p0), [#allocation3], %s349_s17 }
  0x2e   : > { %452 = dma.done.wait (%p596_p7), %s110_s18, 1024  }
  0x2f   : > { %454 = vsyncadd (%p596_p7), %s110_s18, 4294966272  ;;  %vm133_vm0 = vcmask 174080   ;;  %vm136_vm1 = vcmask 23552   ;;  %vm141_vm2 = vcmask 179352   ;;  %v474_v0 = vmov inf   ;;  %v146_v1 = vld [vmem:[%s113_s19] sm:$0xff] }
  0x30   : > { %134 = vst.msk [vmem:[#allocation2] sm:$0x7] %vm133_vm0, %v474_v0  ;;  %135 = vst.msk [vmem:[#allocation2 + $0x13] sm:$0x7] %vm133_vm0, %v474_v0  ;;  %vm139_vm3 = vcmask 21504   ;;  %vm144_vm4 = vcmask 177304  }
  0x31   : > { %138 = vst.msk [vmem:[#allocation2 + $0x8] sm:$0xff] %vm136_vm1, %v474_v0  ;;  %137 = vst.msk [vmem:[#allocation2] sm:$0xff] %vm136_vm1, %v474_v0  ;;  %v350_v2 = vld [vmem:[%s113_s19 + $0x10] sm:$0xff]  ;;  %v352_v3 = vld [vmem:[%s113_s19 + $0x20] sm:$0xff]  ;;  %s475_s9 = smov 3   ;;  %vm171_vm5 = vcmask 154648  }
  0x32   : > { %143 = vst.msk [vmem:[#allocation2 + $0x8] sm:$0xff] %vm141_vm2, %v474_v0  ;;  %142 = vst.msk [vmem:[#allocation2] sm:$0xff] %vm141_vm2, %v474_v0  ;;  %v151_v4 = vmin.f32 %v146_v1, %v350_v2  ;;  %v147_v5 = vld [vmem:[%s113_s19 + $0x8] sm:$0xff]  ;;  %v351_v6 = vld [vmem:[%s113_s19 + $0x18] sm:$0xff]  ;;  %s476_s15 = smov 127   ;;  %s477_s20 = smov 126  }
  0x33   : > { %140 = vst.msk [vmem:[#allocation2 + $0x10] sm:$0x3f] %vm139_vm3, %v474_v0  ;;  %v354_v7 = vld [vmem:[%s113_s19 + $0x30] sm:$0xff]  ;;  %v152_v8 = vmin.f32 %v147_v5, %v351_v6  ;;  %v353_v9 = vld [vmem:[%s113_s19 + $0x28] sm:$0xff]  ;;  %v355_v12 = vld [vmem:[%s113_s19 + $0x38] sm:$0xff]  ;;  %s478_s21 = smov 125  }
  0x34   : > { %145 = vst.msk [vmem:[#allocation2 + $0x10] sm:$0x3f] %vm144_vm4, %v474_v0  ;;  %v156_v10 = vmin.f32 %v151_v4, %v352_v3  ;;  %vm225_vm6 = vcmask 1046528   ;;  %vm240_vm7 = vcmask 1045504   ;;  %vm255_vm8 = vcmask 1044480   ;;  %p130_p8 = scmp.lt.s32.totalorder %s508_s10, 1 }
  0x35   : > { %v157_v11 = vmin.f32 %v152_v8, %v353_v9  ;;  %vm267_vm9 = vcmask 130048   ;;  %vm281_vm10 = vcmask 0  }
  0x36   : > { %v161_v13 = vmin.f32 %v156_v10, %v354_v7  ;;  %s602_s10 = smov (!%p130_p8, %s508_s10), 1 }
  0x37   : > { %v162_v14 = vmin.f32 %v157_v11, %v355_v12  ;;  %s132_s24 = scalar_lea.vmem %s591_s1, %s602_s10 }
  0x38   : > { %165 = vrot.lane.b32.xlu0 %v161_v13, %s475_s9 }
  0x3c   : > { %167 = vrot.lane.b32.xlu0 %v162_v14, %s475_s9 }
  0xaa   : > { %v166_v15 = vpop.permute.xlu0 %165 }
  0xab   : > { %172 = vst.msk [vmem:[#allocation2 + $0x3] sm:$0xff] %vm171_vm5, %v166_v15 }
  0xae   : > { %v168_v16 = vpop.permute.xlu0 %167 }
  0xaf   : > { %173 = vst.msk [vmem:[#allocation2 + $0xb] sm:$0xff] %vm171_vm5, %v168_v16 }
  0xb2   : > { %v174_v17 = vld [vmem:[#allocation2] sm:$0xff] }
  0xb3   : > { %180 = vrot.lane.b32.xlu1 %v174_v17, %s476_s15 }
  0xb6   : > { %v176_v18 = vld [vmem:[#allocation2 + $0x10] sm:$0x3f]  ;;  %v175_v19 = vld [vmem:[#allocation2 + $0x8] sm:$0xff] }
  0xb7   : > { %184 = vrot.lane.b32.xlu0 %v176_v18, %s476_s15  ;;  %182 = vrot.lane.b32.xlu1 %v175_v19, %s476_s15 }
 0x125   : > { %v181_v20 = vpop.permute.xlu1 %180 }
 0x126   : > { %v189_v21 = vmin.f32 %v174_v17, %v181_v20 }
 0x128   : > { %195 = vrot.lane.b32.xlu1 %v189_v21, %s477_s20 }
 0x129   : > { %v185_v22 = vpop.permute.xlu0 %184  ;;  %v183_v23 = vpop.permute.xlu1 %182 }
 0x12a   : > { %v191_v24 = vmin.f32 %v176_v18, %v185_v22  ;;  %v190_v25 = vmin.f32 %v175_v19, %v183_v23 }
 0x12c   : > { %199 = vrot.lane.b32.xlu1 %v191_v24, %s477_s20  ;;  %197 = vrot.lane.b32.xlu0 %v190_v25, %s477_s20 }
 0x19a   : > { %v196_v26 = vpop.permute.xlu1 %195 }
 0x19b   : > { %v204_v27 = vmin.f32 %v189_v21, %v196_v26 }
 0x19d   : > { %210 = vrot.lane.b32.xlu0 %v204_v27, %s478_s21 }
 0x19e   : > { %v198_v28 = vpop.permute.xlu0 %197  ;;  %v200_v29 = vpop.permute.xlu1 %199 }
 0x19f   : > { %v205_v30 = vmin.f32 %v190_v25, %v198_v28  ;;  %v206_v31 = vmin.f32 %v191_v24, %v200_v29 }
 0x1a1   : > { %212 = vrot.lane.b32.xlu1 %v205_v30, %s478_s21  ;;  %214 = vrot.lane.b32.xlu0 %v206_v31, %s478_s21 }
 0x20f   : > { %v211_v32 = vpop.permute.xlu0 %210 }
 0x210   : > { %v219_v33 = vmin.f32 %v204_v27, %v211_v32 }
 0x212   : > { %v226_v38 = vrot.slane %v219_v33, 1 }
 0x213   : > { %v215_v34 = vpop.permute.xlu0 %214  ;;  %v213_v35 = vpop.permute.xlu1 %212 }
 0x214   : > { %v221_v36 = vmin.f32 %v206_v31, %v215_v34  ;;  %v220_v37 = vmin.f32 %v205_v30, %v213_v35 }
 0x216   : > { %v229_v39 = vrot.slane %v221_v36, 1  ;;  %v227_v40 = vrot.slane %v220_v37, 1 }
 0x218   : > { %v236_v41 = vmin.f32 %v221_v36, %v229_v39  ;;  %v228_v42 = vsel %vm225_vm6, %v226_v38, %v227_v40  ;;  %v230_v43 = vsel %vm225_vm6, %v227_v40, %v229_v39 }
 0x219   : > { %v234_v44 = vmin.f32 %v219_v33, %v228_v42  ;;  %v235_v45 = vmin.f32 %v220_v37, %v230_v43 }
 0x21a   : > { %v244_v46 = vrot.slane %v236_v41, 2 }
 0x21b   : > { %v241_v47 = vrot.slane %v234_v44, 2  ;;  %v242_v48 = vrot.slane %v235_v45, 2 }
 0x21c   : > { %v251_v49 = vmin.f32 %v236_v41, %v244_v46 }
 0x21d   : > { %v245_v50 = vsel %vm240_vm7, %v242_v48, %v244_v46  ;;  %v243_v51 = vsel %vm240_vm7, %v241_v47, %v242_v48 }
 0x21e   : > { %v250_v52 = vmin.f32 %v235_v45, %v245_v50  ;;  %v249_v53 = vmin.f32 %v234_v44, %v243_v51  ;;  %v259_v54 = vrot.slane %v251_v49, 3 }
 0x220   : > { %v257_v55 = vrot.slane %v250_v52, 3  ;;  %v256_v56 = vrot.slane %v249_v53, 3 }
 0x222   : > { %v258_v57 = vsel %vm255_vm8, %v256_v56, %v257_v55  ;;  %v260_v58 = vsel %vm255_vm8, %v257_v55, %v259_v54 }
 0x223   : > { %v263_v59 = vmin.f32 %v249_v53, %v258_v57  ;;  %v264_v60 = vmin.f32 %v250_v52, %v260_v58 }
 0x225   : > { %v265_v61 = vand.u32 2147483647, %v263_v59  ;;  %v266_v62 = vand.u32 2147483647, %v264_v60 }
 0x227   : > { %v268_v63 = vsel %vm267_vm9, %v265_v61, 0.0  ;;  %v269_v0 = vsel %vm267_vm9, %v266_v62, 0.0 }
 0x228   : > { %v270_v1 = vadd.f32 %v269_v0, %v268_v63 }
 0x22a   : > { %271 = vadd.xlane.f32.xlu1 %v270_v1 }
 0x2b3   : > { %v272_v2 = vpop.xlane.xlu1 %271 }
 0x2b4   : > { %v273_v3 = vrot.slane %v272_v2, 4 }
 0x2b6   : > { %v274_v4 = vadd.f32 %v273_v3, %v272_v2 }
 0x2b8   : > { %v275_v5 = vrot.slane %v274_v4, 2 }
 0x2ba   : > { %v276_v6 = vadd.f32 %v275_v5, %v274_v4 }
 0x2bc   : > { %v277_v7 = vrot.slane %v276_v6, 1 }
 0x2be   : > { %v278_v8 = vadd.f32 %v277_v7, %v276_v6 }
 0x2c0   : > { %359 = vpush %v278_v8 }
 0x2f1   : > { %s360_s25 = spop %359 }
 0x2f2   : > { %v280_v9 = vstv %s360_s25 }
 0x2f3   : > { %282 = vst.msk [vmem:[%s132_s24] sm:$0x1] %vm281_vm10, %v280_v9 }
 0x2f4 PF: > { %p11_p9 = scmp.ge.s32.totalorder %s511_s11, 4   ;;  %s597_s6 = smov %s461_s7 }
 0x2f5   : > { %s598_s7 = smov %s465_s8  ;;  %s599_s8 = smov %s521_s14 }
 0x2f6   : > { %s600_s9 = smov %s511_s11  ;;  %13 = sbr.rel (!%p11_p9) target bundleno = 3 (0x3), region = 67 }
 0x2fb   :  { %300 = vsyncpa [#allocation4], 1 }
 0x2fc   :  { %302 = vsyncpa [#allocation4 + $0x1], 1 }

</bundles_post_ra>
